<compile_context>
chip_gen: v6e
topology: v6e:2x2x1
jax: 0.10.0
libtpu: 0.0.40
codegen_flags: <defaults>
</compile_context>

<pallas_src>
import jax
import jax.numpy as jnp
import numpy as np
from jax.experimental import pallas as pl
from jax.experimental.pallas import tpu as pltpu


def attention_kernel(q_ref, pm_ref, x_ref, mem_ref, mask_ref,
                     wq_ref, wloc_ref, v_ref,
                     ctx_ref, aw_ref):
    BB, Tp, A = pm_ref.shape
    TwoK = x_ref.shape[2]

    # batched query projection on the MXU: (BB, R)bf16 @ (R, A)bf16 -> (BB, A) f32
    pq = jnp.dot(q_ref[...], wq_ref[...], preferred_element_type=jnp.float32)

    # location conv + dense folded into a single weight -> ONE im2col matmul
    # (BB*Tp, 2K)bf16 @ (2K, A)bf16 -> (BB*Tp, A) f32
    x2 = x_ref[...].reshape(BB * Tp, TwoK)
    loc = jnp.dot(x2, wloc_ref[...],
                  preferred_element_type=jnp.float32).reshape(BB, Tp, A)

    # energies: v . tanh(pq + loc + processed_memory); A on lanes -> VPU mul + lane reduce
    s = jnp.tanh(pq[:, None, :] + loc + pm_ref[...].astype(jnp.float32))    # (BB, Tp, A)
    e = jnp.sum(s * v_ref[0], axis=-1)                                      # (BB, Tp)

    # masked_fill(mask, -inf); padded T columns carry mask==1 so they drop out.
    # NOTE: a row whose user-mask is all-True yields NaN, matching the PyTorch reference.
    e = jnp.where(mask_ref[...] != 0, -jnp.inf, e)

    # softmax over T (lane axis; Tp is a multiple of 128 -> full-lane vregs and a
    # lane-dense store for the attention-weights output)
    m = jnp.max(e, axis=-1, keepdims=True)
    p = jnp.exp(e - m)
    w = p / jnp.sum(p, axis=-1, keepdims=True)                              # (BB, Tp) f32
    aw_ref[...] = w.astype(aw_ref.dtype)

    # context on the (otherwise idle) MXU: (BB,1,Tp)bf16 @ (BB,Tp,E)bf16 -> (BB,1,E) f32
    ctx = jnp.einsum('bqt,bte->bqe', w[:, None, :].astype(mem_ref.dtype),
                     mem_ref[...], preferred_element_type=jnp.float32)
    ctx_ref[...] = ctx[:, 0, :].astype(ctx_ref.dtype)


def _round_up(x, m):
    return -(-x // m) * m


def _vmem_capacity_bytes(default=64 << 20):
    try:
        cap = getattr(pltpu.get_tpu_info(), "vmem_capacity_bytes", None)
        if cap:
            return int(cap)
    except Exception:
        pass
    return default


def attention_forward(params, attention_hidden_state, memory, processed_memory,
                      attention_weights_cat, mask, *, block_b=None,
                      stream_dtype=jnp.bfloat16):
    wq, wconv, wd, v = params['wq'], params['wconv'], params['wd'], params['v']
    B, T, E = memory.shape
    A, R = wq.shape
    F_, c_in, K = wconv.shape
    assert c_in == 2
    assert K % 2 == 1, "location conv 'same' padding assumes an odd kernel size"
    pad = (K - 1) // 2
    TwoK = 2 * K
    elt = jnp.dtype(stream_dtype).itemsize

    # --- one-time weight re-layouts / folding (call-invariant, no per-call hoist) ---
    wq_t = jnp.asarray(wq, jnp.float32).T.astype(stream_dtype)                  # (R, A)
    wconv_flat = jnp.transpose(jnp.asarray(wconv, jnp.float32),
                               (1, 2, 0)).reshape(TwoK, F_)                     # (2K, F)
    wd_t = jnp.asarray(wd, jnp.float32).T                                       # (F, A)
    wloc = (wconv_flat @ wd_t).astype(stream_dtype)                             # (2K, A)
    v_row = jnp.asarray(v, jnp.float32).reshape(1, A)                           # (1, A)

    # --- pad T up to a lane-dense multiple of 128 (padded columns masked out) ---
    Tp = _round_up(T, 128)
    pt = Tp - T
    memory_p = jnp.pad(memory, ((0, 0), (0, pt), (0, 0)))
    pm_p = jnp.pad(processed_memory, ((0, 0), (0, pt), (0, 0)))
    awc_p = jnp.pad(attention_weights_cat, ((0, 0), (0, 0), (0, pt)))
    mask_i = (jnp.zeros((B, T), jnp.int32) if mask is None
              else mask.astype(jnp.int32))
    mask_i = jnp.pad(mask_i, ((0, 0), (0, pt)), constant_values=1)

    # im2col of the (small) attention-weight history, streamed in bf16.
    # TODO(synk): for large kernel sizes (K~31) build the K shifted taps in-kernel
    # from the raw (B, 2, T) history with pltpu.roll to avoid the 2K x HBM blow-up.
    awc_win = jnp.pad(awc_p, ((0, 0), (0, 0), (pad, pad)))                      # (B, 2, Tp+2p)
    x_im2col = jnp.stack([awc_win[:, c, k:k + Tp]
                          for c in range(2) for k in range(K)], axis=-1)        # (B, Tp, 2K)

    query = attention_hidden_state

    # --- batch blocking (generation aware) ---
    vmem_cap = _vmem_capacity_bytes()
    if block_b is None:
        # 64 MiB VMEM parts (v7x) -> smaller slab; 128 MiB parts (v5e/v6e) -> bigger slab.
        block_b = 8 if vmem_cap <= (64 << 20) else 16
    BB = B if B <= block_b else block_b
    nb = -(-B // BB)
    if nb == 1 and B > 8 and vmem_cap <= (64 << 20):
        # 2-TC parts (v7x): give the "parallel" grid axis >= 2 steps so both cores work.
        BB = _round_up(-(-B // 2), 8)
        nb = -(-B // BB)
    Bp = nb * BB
    if Bp != B:
        pb = Bp - B
        query = jnp.pad(query, ((0, pb), (0, 0)))
        memory_p = jnp.pad(memory_p, ((0, pb), (0, 0), (0, 0)))
        pm_p = jnp.pad(pm_p, ((0, pb), (0, 0), (0, 0)))
        x_im2col = jnp.pad(x_im2col, ((0, pb), (0, 0), (0, 0)))
        mask_i = jnp.pad(mask_i, ((0, pb), (0, 0)))   # padded batch rows unmasked -> no NaN

    # bf16 streaming of the big tensors (all accumulation stays f32 in-kernel)
    query = query.astype(stream_dtype)
    pm_p = pm_p.astype(stream_dtype)
    memory_p = memory_p.astype(stream_dtype)
    x_im2col = x_im2col.astype(stream_dtype)

    # --- explicit VMEM budget: double-buffered input+output tiles + resident weights ---
    in_tile = (BB * R + BB * Tp * A + BB * Tp * TwoK + BB * Tp * E) * elt + BB * Tp * 4
    w_bytes = (R * A + TwoK * A) * elt + A * 4
    out_tile = (BB * E + BB * Tp) * 4
    vmem_need = 2 * (in_tile + out_tile) + w_bytes + (2 << 20)
    vmem_limit = int(min(max(vmem_need, 32 << 20), int(0.9 * vmem_cap)))

    cost = pl.CostEstimate(
        flops=int(2 * Bp * R * A + 2 * Bp * Tp * TwoK * A
                  + 2 * Bp * Tp * A + 2 * Bp * Tp * E + 5 * Bp * Tp),
        transcendentals=int(Bp * Tp * A + Bp * Tp),
        bytes_accessed=int((Bp * R + Bp * Tp * A + Bp * Tp * TwoK + Bp * Tp * E) * elt
                           + Bp * Tp * 4 + w_bytes + (Bp * E + Bp * Tp) * 4))

    in_specs = (
        pl.BlockSpec((BB, R), lambda g: (g, 0)),            # query (bf16)
        pl.BlockSpec((BB, Tp, A), lambda g: (g, 0, 0)),      # processed_memory (A on lanes)
        pl.BlockSpec((BB, Tp, TwoK), lambda g: (g, 0, 0)),   # im2col'd attention weights
        pl.BlockSpec((BB, Tp, E), lambda g: (g, 0, 0)),      # memory
        pl.BlockSpec((BB, Tp), lambda g: (g, 0)),            # mask
        pl.BlockSpec((R, A), lambda g: (0, 0)),              # W_query^T (resident)
        pl.BlockSpec((TwoK, A), lambda g: (0, 0)),           # folded location weight
        pl.BlockSpec((1, A), lambda g: (0, 0)),              # v
    )
    out_specs = (
        pl.BlockSpec((BB, E), lambda g: (g, 0)),             # context
        pl.BlockSpec((BB, Tp), lambda g: (g, 0)),            # attention weights (lane-dense)
    )
    out_shape = (jax.ShapeDtypeStruct((Bp, E), jnp.float32),
                 jax.ShapeDtypeStruct((Bp, Tp), jnp.float32))

    ctx, aw = pl.pallas_call(
        attention_kernel,
        grid=(nb,),
        in_specs=in_specs,
        out_specs=out_specs,
        out_shape=out_shape,
        cost_estimate=cost,
        compiler_params=pltpu.CompilerParams(
            dimension_semantics=("parallel",),
            vmem_limit_bytes=vmem_limit),
    )(query, pm_p, x_im2col, memory_p, mask_i, wq_t, wloc, v_row)

    # TODO(synk): for very long encoder lengths (T >= ~2-4k) on 64 MiB-VMEM parts,
    # add a second "arbitrary" grid axis over T with online-softmax accumulators.
    return ctx[:B], aw[:B, :T]


def attention_ref(params, query, memory, processed_memory, awc, mask):
    """Pure-JAX f32 reference of the PyTorch forward (for correctness check)."""
    wq, wconv, wd, v = params['wq'], params['wconv'], params['wd'], params['v']
    pad = (wconv.shape[2] - 1) // 2
    pq = (query @ wq.T)[:, None, :]                                  # (B, 1, A)
    loc = jax.lax.conv_general_dilated(
        awc, wconv, window_strides=(1,), padding=[(pad, pad)],
        dimension_numbers=('NCH', 'OIH', 'NCH'))                     # (B, F, T)
    loc = jnp.transpose(loc, (0, 2, 1)) @ wd.T                       # (B, T, A)
    e = (jnp.tanh(pq + loc + processed_memory) @ v.T)[..., 0]        # (B, T)
    if mask is not None:
        e = jnp.where(mask, -jnp.inf, e)
    w = jax.nn.softmax(e, axis=1)
    ctx = jnp.einsum('bt,bte->be', w, memory)
    return ctx, w


if __name__ == "__main__":
    # small shapes consistent with the module
    B, T = 2, 8                       # batch, encoder length
    R = 32                            # attention_rnn_dim
    E = 16                            # embedding_dim (encoder output dim)
    A = 32                            # attention_dim
    F_ = 8                            # attention_location_n_filters
    K = 3                             # attention_location_kernel_size (odd)

    key = jax.random.PRNGKey(0)
    ks = jax.random.split(key, 8)
    # deterministic synthetic parameters (torch weight conventions: (out, in[, k]))
    params = {
        'wq': 0.1 * jax.random.normal(ks[0], (A, R), jnp.float32),         # query_layer
        'wconv': 0.1 * jax.random.normal(ks[1], (F_, 2, K), jnp.float32),  # location_conv
        'wd': 0.1 * jax.random.normal(ks[2], (A, F_), jnp.float32),        # location_dense
        'v': 0.1 * jax.random.normal(ks[3], (1, A), jnp.float32),          # v
    }
    # TODO(synk): memory_layer of Attention is unused in forward() (processed_memory is
    # an input), so it is intentionally not materialized here.

    query = jax.random.normal(ks[4], (B, R), jnp.float32)
    memory = jax.random.normal(ks[5], (B, T, E), jnp.float32)
    processed_memory = jax.random.normal(ks[6], (B, T, A), jnp.float32)
    awc = jax.nn.softmax(jax.random.normal(ks[7], (B, 2, T), jnp.float32), axis=-1)
    mask = jnp.zeros((B, T), dtype=bool).at[1, T - 2:].set(True)

    ctx, aw = attention_forward(params, query, memory, processed_memory, awc, mask)
    jax.block_until_ready((ctx, aw))

    ctx_r, aw_r = attention_ref(params, query, memory, processed_memory, awc, mask)
    # Tolerance accounts for intentional bf16 streaming of the large activations
    # (inputs/weights rounded to bf16 before the MXU; accumulation is f32).
    np.testing.assert_allclose(np.asarray(ctx), np.asarray(ctx_r), rtol=2e-2, atol=2e-2)
    np.testing.assert_allclose(np.asarray(aw), np.asarray(aw_r), rtol=2e-2, atol=2e-2)

    print("KERNEL_OK")
</pallas_src>

<mosaic_0001>
module attributes {stable_mosaic.version = 11 : i64} {
  func.func @attention_kernel(%arg0: i32, %arg1: memref<2x32xbf16, #tpu.memory_space<vmem>>, %arg2: memref<2x128x32xbf16, #tpu.memory_space<vmem>>, %arg3: memref<2x128x6xbf16, #tpu.memory_space<vmem>>, %arg4: memref<2x128x16xbf16, #tpu.memory_space<vmem>>, %arg5: memref<2x128xi32, #tpu.memory_space<vmem>>, %arg6: memref<32x32xbf16, #tpu.memory_space<vmem>>, %arg7: memref<6x32xbf16, #tpu.memory_space<vmem>>, %arg8: memref<1x32xf32, #tpu.memory_space<vmem>>, %arg9: memref<2x16xf32, #tpu.memory_space<vmem>>, %arg10: memref<2x128xf32, #tpu.memory_space<vmem>>) attributes {dimension_semantics = [#tpu.dimension_semantics<parallel>], iteration_bounds = array<i64: 1>, scalar_prefetch = 0 : i64, scratch_operands = 0 : i64, tpu.core_type = #tpu.core_type<tc>, window_params = [{transform_indices = @transform_0, window_bounds = array<i64: 2, 32>}, {transform_indices = @transform_1, window_bounds = array<i64: 2, 128, 32>}, {transform_indices = @transform_2, window_bounds = array<i64: 2, 128, 6>}, {transform_indices = @transform_3, window_bounds = array<i64: 2, 128, 16>}, {transform_indices = @transform_4, window_bounds = array<i64: 2, 128>}, {pipeline_mode = #tpu.pipeline_mode<synchronous>, transform_indices = @transform_5, window_bounds = array<i64: 32, 32>}, {pipeline_mode = #tpu.pipeline_mode<synchronous>, transform_indices = @transform_6, window_bounds = array<i64: 6, 32>}, {pipeline_mode = #tpu.pipeline_mode<synchronous>, transform_indices = @transform_7, window_bounds = array<i64: 1, 32>}, {transform_indices = @transform_8, window_bounds = array<i64: 2, 16>}, {transform_indices = @transform_9, window_bounds = array<i64: 2, 128>}]} {
    %c0 = arith.constant 0 : index
    %c0_0 = arith.constant 0 : index
    %0 = vector.load %arg1[%c0, %c0_0] : memref<2x32xbf16, #tpu.memory_space<vmem>>, vector<2x32xbf16>
    %c0_1 = arith.constant 0 : index
    %c0_2 = arith.constant 0 : index
    %1 = vector.load %arg6[%c0_1, %c0_2] : memref<32x32xbf16, #tpu.memory_space<vmem>>, vector<32x32xbf16>
    %cst = arith.constant dense<0.000000e+00> : vector<2x32xf32>
    %2 = tpu.matmul %0, %1, %cst {dimension_numbers = #tpu.dot_dimension_numbers<[1], [0], [0], [1], [0, 0, 1, 1], [], []>} : vector<2x32xbf16>, vector<32x32xbf16>, vector<2x32xf32> -> vector<2x32xf32>
    %c0_3 = arith.constant 0 : index
    %c0_4 = arith.constant 0 : index
    %c0_5 = arith.constant 0 : index
    %3 = vector.load %arg3[%c0_3, %c0_4, %c0_5] : memref<2x128x6xbf16, #tpu.memory_space<vmem>>, vector<2x128x6xbf16>
    %4 = vector.shape_cast %3 : vector<2x128x6xbf16> to vector<256x6xbf16>
    %c0_6 = arith.constant 0 : index
    %c0_7 = arith.constant 0 : index
    %5 = vector.load %arg7[%c0_6, %c0_7] : memref<6x32xbf16, #tpu.memory_space<vmem>>, vector<6x32xbf16>
    %cst_8 = arith.constant dense<0.000000e+00> : vector<256x32xf32>
    %6 = tpu.matmul %4, %5, %cst_8 {dimension_numbers = #tpu.dot_dimension_numbers<[1], [0], [0], [1], [0, 0, 1, 1], [], []>} : vector<256x6xbf16>, vector<6x32xbf16>, vector<256x32xf32> -> vector<256x32xf32>
    %7 = vector.shape_cast %6 : vector<256x32xf32> to vector<2x128x32xf32>
    %8 = vector.shape_cast %2 : vector<2x32xf32> to vector<2x1x32xf32>
    %9 = vector.broadcast %8 : vector<2x1x32xf32> to vector<2x128x32xf32>
    %10 = arith.addf %9, %7 : vector<2x128x32xf32>
    %c0_9 = arith.constant 0 : index
    %c0_10 = arith.constant 0 : index
    %c0_11 = arith.constant 0 : index
    %11 = vector.load %arg2[%c0_9, %c0_10, %c0_11] : memref<2x128x32xbf16, #tpu.memory_space<vmem>>, vector<2x128x32xbf16>
    %12 = arith.extf %11 : vector<2x128x32xbf16> to vector<2x128x32xf32>
    %13 = arith.addf %10, %12 : vector<2x128x32xf32>
    %14 = math.tanh %13 : vector<2x128x32xf32>
    %c0_12 = arith.constant 0 : index
    %c0_13 = arith.constant 0 : index
    %15 = vector.load %arg8[%c0_12, %c0_13] : memref<1x32xf32, #tpu.memory_space<vmem>>, vector<1x32xf32>
    %16 = vector.shape_cast %15 : vector<1x32xf32> to vector<32xf32>
    %17 = vector.shape_cast %16 : vector<32xf32> to vector<1x1x32xf32>
    %18 = vector.broadcast %17 : vector<1x1x32xf32> to vector<2x128x32xf32>
    %19 = arith.mulf %14, %18 : vector<2x128x32xf32>
    %cst_14 = arith.constant dense<0.000000e+00> : vector<2x128xf32>
    %20 = vector.multi_reduction <add>, %19, %cst_14 [2] : vector<2x128x32xf32> to vector<2x128xf32>
    %c0_15 = arith.constant 0 : index
    %c0_16 = arith.constant 0 : index
    %21 = vector.load %arg5[%c0_15, %c0_16] : memref<2x128xi32, #tpu.memory_space<vmem>>, vector<2x128xi32>
    %c0_i32 = arith.constant 0 : i32
    %22 = vector.broadcast %c0_i32 : i32 to vector<2x128xi32>
    %23 = arith.cmpi ne, %21, %22 : vector<2x128xi32>
    %cst_17 = arith.constant 0xFF800000 : f32
    %24 = vector.broadcast %cst_17 : f32 to vector<2x128xf32>
    %25 = arith.select %23, %24, %20 : vector<2x128xi1>, vector<2x128xf32>
    %cst_18 = arith.constant dense<0xFF800000> : vector<2xf32>
    %26 = vector.multi_reduction <maximumf>, %25, %cst_18 [1] : vector<2x128xf32> to vector<2xf32>
    %27 = vector.shape_cast %26 : vector<2xf32> to vector<2x1xf32>
    %28 = vector.broadcast %27 : vector<2x1xf32> to vector<2x128xf32>
    %29 = arith.subf %25, %28 : vector<2x128xf32>
    %30 = math.exp %29 : vector<2x128xf32>
    %cst_19 = arith.constant dense<0.000000e+00> : vector<2xf32>
    %31 = vector.multi_reduction <add>, %30, %cst_19 [1] : vector<2x128xf32> to vector<2xf32>
    %32 = vector.shape_cast %31 : vector<2xf32> to vector<2x1xf32>
    %33 = vector.broadcast %32 : vector<2x1xf32> to vector<2x128xf32>
    %34 = arith.divf %30, %33 : vector<2x128xf32>
    %c0_20 = arith.constant 0 : index
    %c0_21 = arith.constant 0 : index
    %35 = vector.load %arg10[%c0_20, %c0_21] : memref<2x128xf32, #tpu.memory_space<vmem>>, vector<2x128xf32>
    tpu.vector_store %arg10[%c0_20, %c0_21], %34 {strides = array<i32>} : memref<2x128xf32, #tpu.memory_space<vmem>>, vector<2x128xf32>,
    %36 = vector.shape_cast %34 : vector<2x128xf32> to vector<2x1x128xf32>
    %37 = arith.truncf %36 : vector<2x1x128xf32> to vector<2x1x128xbf16>
    %c0_22 = arith.constant 0 : index
    %c0_23 = arith.constant 0 : index
    %c0_24 = arith.constant 0 : index
    %38 = vector.load %arg4[%c0_22, %c0_23, %c0_24] : memref<2x128x16xbf16, #tpu.memory_space<vmem>>, vector<2x128x16xbf16>
    "tpu.trace_start"() <{level = 10 : i32, message = "bqt,bte->bqe"}> : () -> ()
    %cst_25 = arith.constant dense<0.000000e+00> : vector<2x1x16xf32>
    %39 = tpu.matmul %37, %38, %cst_25 {dimension_numbers = #tpu.dot_dimension_numbers<[2], [1], [1], [2], [0, 0, 0, 1, 1, 2], [0], [0]>} : vector<2x1x128xbf16>, vector<2x128x16xbf16>, vector<2x1x16xf32> -> vector<2x1x16xf32>
    "tpu.trace_stop"() : () -> ()
    %40 = vector.shape_cast %39 : vector<2x1x16xf32> to vector<2x16xf32>
    %c0_26 = arith.constant 0 : index
    %c0_27 = arith.constant 0 : index
    %41 = vector.load %arg9[%c0_26, %c0_27] : memref<2x16xf32, #tpu.memory_space<vmem>>, vector<2x16xf32>
    tpu.vector_store %arg9[%c0_26, %c0_27], %40 {strides = array<i32>} : memref<2x16xf32, #tpu.memory_space<vmem>>, vector<2x16xf32>,
    return
  }
  func.func @transform_0(%arg0: i32) -> (i32, i32) {
    %c0_i32 = arith.constant 0 : i32
    %c0_i32_0 = arith.constant 0 : i32
    return %arg0, %c0_i32 : i32, i32
  }
  func.func @transform_1(%arg0: i32) -> (i32, i32, i32) {
    %c0_i32 = arith.constant 0 : i32
    %c0_i32_0 = arith.constant 0 : i32
    %c0_i32_1 = arith.constant 0 : i32
    return %arg0, %c0_i32, %c0_i32_0 : i32, i32, i32
  }
  func.func @transform_2(%arg0: i32) -> (i32, i32, i32) {
    %c0_i32 = arith.constant 0 : i32
    %c0_i32_0 = arith.constant 0 : i32
    %c0_i32_1 = arith.constant 0 : i32
    return %arg0, %c0_i32, %c0_i32_0 : i32, i32, i32
  }
  func.func @transform_3(%arg0: i32) -> (i32, i32, i32) {
    %c0_i32 = arith.constant 0 : i32
    %c0_i32_0 = arith.constant 0 : i32
    %c0_i32_1 = arith.constant 0 : i32
    return %arg0, %c0_i32, %c0_i32_0 : i32, i32, i32
  }
  func.func @transform_4(%arg0: i32) -> (i32, i32) {
    %c0_i32 = arith.constant 0 : i32
    %c0_i32_0 = arith.constant 0 : i32
    return %arg0, %c0_i32 : i32, i32
  }
  func.func @transform_5(%arg0: i32) -> (i32, i32) {
    %c0_i32 = arith.constant 0 : i32
    %c0_i32_0 = arith.constant 0 : i32
    %c0_i32_1 = arith.constant 0 : i32
    return %c0_i32, %c0_i32_0 : i32, i32
  }
  func.func @transform_6(%arg0: i32) -> (i32, i32) {
    %c0_i32 = arith.constant 0 : i32
    %c0_i32_0 = arith.constant 0 : i32
    %c0_i32_1 = arith.constant 0 : i32
    return %c0_i32, %c0_i32_0 : i32, i32
  }
  func.func @transform_7(%arg0: i32) -> (i32, i32) {
    %c0_i32 = arith.constant 0 : i32
    %c0_i32_0 = arith.constant 0 : i32
    %c0_i32_1 = arith.constant 0 : i32
    return %c0_i32, %c0_i32_0 : i32, i32
  }
  func.func @transform_8(%arg0: i32) -> (i32, i32) {
    %c0_i32 = arith.constant 0 : i32
    %c0_i32_0 = arith.constant 0 : i32
    return %arg0, %c0_i32 : i32, i32
  }
  func.func @transform_9(%arg0: i32) -> (i32, i32) {
    %c0_i32 = arith.constant 0 : i32
    %c0_i32_0 = arith.constant 0 : i32
    return %arg0, %c0_i32 : i32, i32
  }
}

</mosaic_0001>

<bundles_post_ra>
// kernel: tpu_custom_call.1
= control target key start
LH: loop header
LB: loop body
LE: loop exit
PB: predicated region body
PF: predicated region fallthrough
CT: control target
= control target key end

     0   :  { %15 = vsyncpa [#allocation3], 0  ;;  %vm257_vm0 = vcmask 1042432   ;;  %v1667_v1 = vmov 0.0   ;;  %vm208_vm1 = vcmask 48128   ;;  %vm1668_vm2 = vmmov 0   ;;  %s2205_s0 = inlined_call_operand.vmem [shape: bf16[2,32], index: 0, kind: input, shape index: {}]   ;;  %s2206_s1 = inlined_call_operand.vmem [shape: bf16[2,128,32], index: 1, kind: input, shape index: {}]   ;;  %s2207_s2 = inlined_call_operand.vmem [shape: bf16[2,128,6], index: 2, kind: input, shape index: {}]   ;;  %s2208_s3 = inlined_call_operand.vmem [shape: bf16[2,128,16], index: 3, kind: input, shape index: {}]   ;;  %s2209_s4 = inlined_call_operand.vmem [shape: s32[2,128], index: 4, kind: input, shape index: {}]   ;;  %s2210_s5 = inlined_call_operand.vmem [shape: bf16[32,32], index: 5, kind: input, shape index: {}]   ;;  %s2211_s6 = inlined_call_operand.vmem [shape: bf16[6,32], index: 6, kind: input, shape index: {}]   ;;  %s2212_s7 = inlined_call_operand.vmem [shape: f32[1,32], index: 7, kind: input, shape index: {}]   ;;  %s2213_s8 = inlined_call_operand.hbm [shape: f32[2,16], index: 8, kind: output, shape index: {0}]   ;;  %s2214_s9 = inlined_call_operand.hbm [shape: f32[2,128], index: 9, kind: output, shape index: {1}]  }
   0x1   :  { %v127_v0 = vld [vmem:[%s2211_s6] sm:$0x7]  ;;  %1430 = vmatprep.subr.bf16.mxu0 %v1667_v1  ;;  %v1521_v3 = vld [vmem:[%s2210_s5 + $0x8] sm:$0xff]   ;;  %1434 = vmatprep.mubr.msk.bf16.mxu0 %vm1668_vm2, %v1667_v1  ;;  %v1525_v7 = vld [vmem:[%s2207_s2 + $0x50] sm:$0xff]   ;;  %vm51_vm3 = vcmask 261120  }
   0x2   :  { %1515 = vmatprep.subr.msk.bf16.mxu1 %vm257_vm0, %v127_v0  ;;  %v259_v2 = vsel %vm257_vm0, %v127_v0, 0  ;;  %v1522_v4 = vld [vmem:[%s2207_s2 + $0x40] sm:$0xff]   ;;  %1431 = vmatpush3.bf16.msra.mxu0 %v1521_v3  ;;  %v1523_v5 = vld [vmem:[%s2207_s2 + $0x48] sm:$0xff]   ;;  %v1526_v10 = vld [vmem:[%s2207_s2 + $0x58] sm:$0xff]  }
   0x3   :  { %1513 = vmatpush3.bf16.msra.mxu1 %v259_v2  ;;  %1456 = vmatprep.mubr.msk.bf16.mxu1 %vm208_vm1, %v1522_v4  ;;  %v1524_v6 = vld [vmem:[%s2210_s5] sm:$0xff]   ;;  %v1528_v12 = vld [vmem:[%s2207_s2 + $0x8] sm:$0xff]   ;;  %v1531_v13 = vld [vmem:[%s2207_s2 + $0x10] sm:$0xff]  }
   0x4   :  { %1492 = vmatprep.subr.bf16.mxu1 %v1667_v1  ;;  %1432 = vmatprep.subr.bf16.mxu0 %v1667_v1  ;;  %v34_v8 = vld [vmem:[%s2205_s0] sm:$0x1]  ;;  %v1530_v14 = vld [vmem:[%s2207_s2 + $0x68] sm:$0xff]   ;;  %v1533_v15 = vld [vmem:[%s2207_s2 + $0x70] sm:$0xff]  }
   0x5   :  { %v1527_v9 = vld [vmem:[%s2207_s2] sm:$0xff]   ;;  %v1532_v16 = vld [vmem:[%s2207_s2 + $0x18] sm:$0xff]  }
   0x6   :  { %1457 = vmatmul.mubr.msk.bf16.vlgmr.msra.gmra.mxu1 %vm208_vm1, %v1523_v5  ;;  %1433 = vmatpush3.bf16.msra.mxu0 %v1524_v6  ;;  %v1529_v11 = vld [vmem:[%s2207_s2 + $0x60] sm:$0xff]   ;;  %v1534_v18 = vld [vmem:[%s2207_s2 + $0x78] sm:$0xff]  }
   0x7   :  { %1460 = vmatprep.mubr.msk.bf16.mxu1 %vm208_vm1, %v1525_v7  ;;  %1514 = vmatprep.subr.msk.bf16.mxu0 %vm257_vm0, %v127_v0  ;;  %v1535_v17 = vld [vmem:[%s2207_s2 + $0x20] sm:$0xff]  }
   0x9   :  { %1435 = vmatmul.mubr.msk.bf16.vlgmr.msra.gmra.mxu0 %vm51_vm3, %v34_v8 }
   0xa   :  { %1439 = vmatpush3.bf16.msra.mxu0 %v259_v2  ;;  %1440 = vmatprep.mubr.msk.bf16.mxu0 %vm208_vm1, %v1527_v9 }
   0xb   :  { %1472 = vmatprep.subr.bf16.mxu0 %v1667_v1 }
   0xe   :  { %1461 = vmatmul.mubr.msk.bf16.gmra.mxu1 %vm208_vm1, %v1526_v10 }
   0xf   :  { %1464 = vmatprep.mubr.msk.bf16.mxu1 %vm208_vm1, %v1529_v11 }
  0x11   :  { %1441 = vmatmul.mubr.msk.bf16.vlgmr.msra.gmra.mxu0 %vm208_vm1, %v1528_v12 }
  0x12   :  { %1444 = vmatprep.mubr.msk.bf16.mxu0 %vm208_vm1, %v1531_v13 }
  0x16   :  { %1465 = vmatmul.mubr.msk.bf16.gmra.mxu1 %vm208_vm1, %v1530_v14 }
  0x17   :  { %1468 = vmatprep.mubr.msk.bf16.mxu1 %vm208_vm1, %v1533_v15 }
  0x19   :  { %1445 = vmatmul.mubr.msk.bf16.gmra.mxu0 %vm208_vm1, %v1532_v16 }
  0x1a   :  { %1448 = vmatprep.mubr.msk.bf16.mxu0 %vm208_vm1, %v1535_v17 }
  0x1e   :  { %1469 = vmatmul.mubr.msk.bf16.gmra.mxu1 %vm208_vm1, %v1534_v18 }
  0x1f   :  { %16 = vsyncpa [#allocation5], 0  ;;  %v1536_v19 = vld [vmem:[%s2207_s2 + $0x28] sm:$0xff]   ;;  %1508 = vmatprep.mubr.msk.bf16.mxu1 %vm1668_vm2, %v1667_v1  ;;  %v1537_v20 = vld [vmem:[%s2207_s2 + $0x30] sm:$0xff]   ;;  %v1669_v22 = vmov 1966171168   ;;  %v426_v24 = vlaneseq }
  0x20   :  { %v1538_v21 = vld [vmem:[%s2207_s2 + $0x38] sm:$0xff]   ;;  %v424_v23 = vunpack.c.l.s4 %v1669_v22  ;;  %v1384_v39 = vld [vmem:[%s2206_s1 + $0x40] sm:$0xff]   ;;  %v1377_v48 = vld [vmem:[%s2206_s1 + $0x8] sm:$0xff]   ;;  %vm795_vm4 = vcmask 130112   ;;  %vm802_vm5 = vcmask 195712   ;;  %vm809_vm6 = vcmask 261312  }
  0x21   :  { %1449 = vmatmul.mubr.msk.bf16.gmra.mxu0 %vm208_vm1, %v1536_v19  ;;  %v1813_v26 = vshrl.u32 %v426_v24, 7  ;;  %v1347_v45 = vunpack.c.l.bf16 %v1384_v39  ;;  %v1348_v46 = vunpack.c.h.bf16 %v1384_v39  ;;  %v1314_v54 = vld [vmem:[%s2206_s1] sm:$0xff]   ;;  %v1319_v56 = vunpack.c.l.bf16 %v1377_v48  ;;  %v1391_v14 = vld [vmem:[%s2206_s1 + $0x78] sm:$0xff]  }
  0x22   :  { %1452 = vmatprep.mubr.msk.bf16.mxu0 %vm208_vm1, %v1537_v20  ;;  %v425_v25 = vunpack.c.0.s8 %v424_v23  ;;  %v1315_v62 = vunpack.c.l.bf16 %v1314_v54  ;;  %v1320_v4 = vunpack.c.h.bf16 %v1377_v48  ;;  %v1861_v11 = vld [vmem:[%s2206_s1 + $0x60] sm:$0xff]   ;;  %v1316_v13 = vunpack.c.h.bf16 %v1314_v54  ;;  %v1379_v15 = vld [vmem:[%s2206_s1 + $0x18] sm:$0xff]   ;;  %v1390_v20 = vld [vmem:[%s2206_s1 + $0x70] sm:$0xff]  }
  0x23   :  { %v447_v38 = vsub.s32 0, %v1813_v26  ;;  %v1364_v17 = vunpack.c.h.bf16 %v1861_v11  ;;  %v1375_v22 = vunpack.c.l.bf16 %v1391_v14  ;;  %v1884_v39 = vld [vmem:[%s2212_s7] ss:$0 sm:$0xff]  ;;  %vm823_vm7 = vcmask 392512  }
  0x24   :  { %v1818_v29 = vsub.s32 %v425_v25, %v1813_v26  ;;  %vm816_vm8 = vcmask 326912   ;;  %vm830_vm9 = vcmask 458112   ;;  %vm837_vm10 = vcmask 523712  }
  0x25   :  { %vm844_vm11 = vcmask 589312   ;;  %vm851_vm12 = vcmask 654912   ;;  %vm858_vm13 = vcmask 720512   ;;  %vm865_vm14 = vcmask 786112  }
  0x26   :  { %vm872_vm15 = vcmask 851712   ;;  %vm879_vm0 = vcmask 917312  }
  0x29   :  { %1453 = vmatmul.mubr.msk.bf16.gmra.mxu0 %vm208_vm1, %v1538_v21  ;;  %vm886_vm1 = vcmask 982912  }
  0x2a   :  { %1488 = vmatprep.mubr.msk.bf16.mxu0 %vm1668_vm2, %v1667_v1  ;;  %vm893_vm2 = vcmask 1048512  }
  0xc6   :  { %v1815_v27 = vpop.f32.mrf.mxu1 }
  0xc8   :  { %v359_v28 = vpop.f32.mrf.mxu1 }
  0xc9   :  { %v89_v31 = vpop.f32.mrf.mxu0 }
  0xca   :  { %v1820_v30 = vpop.f32.mrf.mxu1  ;;  %v429_v32 = vrot.slane %v89_v31, %v1818_v29  ;;  %v1327_v31 = vunpack.c.l.bf16 %v1379_v15 }
  0xcb   :  { %v1436_v34 = vpop.f32.mrf.mxu0 }
  0xcc   :  { %v362_v33 = vpop.f32.mrf.mxu1  ;;  %v430_v35 = vcombine.high %v429_v32, %v429_v32  ;;  %v437_v37 = vrot.slane %v429_v32, %v1818_v29  ;;  %v1378_v32 = vld [vmem:[%s2206_s1 + $0x10] sm:$0xff]  }
  0xcd   :  { %v92_v40 = vpop.f32.mrf.mxu0 }
  0xce   :  { %v1823_v36 = vpop.f32.mrf.mxu1  ;;  %v444_v41 = vrot.slane %v430_v35, %v1818_v29  ;;  %v1840_v49 = vrot.slane %v437_v37, %v447_v38  ;;  %v1371_v37 = vunpack.c.l.bf16 %v1390_v20  ;;  %v1323_v40 = vunpack.c.l.bf16 %v1378_v32 }
  0xcf   :  { %v1437_v43 = vpop.f32.mrf.mxu0 }
  0xd0   :  { %v1831_v42 = vpop.f32.mrf.mxu1  ;;  %v1833_v44 = vrot.slane %v444_v41, %v447_v38 }
  0xd1   :  { %v1442_v50 = vpop.f32.mrf.mxu0 }
  0xd2   :  { %v1835_v47 = vpop.f32.mrf.mxu1  ;;  %v471_v51 = vadd.f32 %v1833_v44, %v359_v28  ;;  %v472_v52 = vadd.f32 %v1833_v44, %v362_v33  ;;  %v457_v55 = vadd.f32 %v1442_v50, %v1840_v49 }
  0xd3   :  { %v295_v57 = vpop.f32.mrf.mxu0 }
  0xd4   :  { %v1844_v53 = vpop.f32.mrf.mxu1  ;;  %v567_v58 = vadd.f32 %v1347_v45, %v471_v51  ;;  %v568_v59 = vadd.f32 %v1348_v46, %v472_v52  ;;  %v455_v61 = vadd.f32 %v1840_v49, %v295_v57  ;;  %v553_v2 = vadd.f32 %v1319_v56, %v457_v55 }
  0xd5   :  { %v1443_v63 = vpop.f32.mrf.mxu0  ;;  %v1376_v45 = vunpack.c.h.bf16 %v1391_v14  ;;  %v1372_v52 = vunpack.c.h.bf16 %v1390_v20  ;;  %v1900_v14 = vld [vmem:[%s2206_s1 + $0x50] sm:$0xff]  }
  0xd6   :  { %v1850_v60 = vpop.f32.mrf.mxu1  ;;  %1555 = vtanh.f32 %v567_v58  ;;  %v458_v3 = vadd.f32 %v1443_v63, %v1840_v49  ;;  %v551_v7 = vadd.f32 %v1315_v62, %v455_v61  ;;  %v1385_v63 = vld [vmem:[%s2206_s1 + $0x48] sm:$0xff]  }
  0xd7   :  { %1557 = vtanh.f32 %v568_v59  ;;  %v298_v5 = vpop.f32.mrf.mxu0 }
  0xd8   :  { %v1853_v0 = vpop.f32.mrf.mxu1  ;;  %1559 = vtanh.f32 %v553_v2  ;;  %v554_v10 = vadd.f32 %v1320_v4, %v458_v3  ;;  %v456_v12 = vadd.f32 %v1840_v49, %v298_v5  ;;  %v1328_v4 = vunpack.c.h.bf16 %v1379_v15 }
  0xd9   :  { %v1446_v8 = vpop.f32.mrf.mxu0  ;;  %1561 = vtanh.f32 %v551_v7 }
  0xda   :  { %v1856_v6 = vpop.f32.mrf.mxu1  ;;  %1563 = vtanh.f32 %v554_v10  ;;  %v552_v25 = vadd.f32 %v1316_v13, %v456_v12  ;;  %v461_v28 = vadd.f32 %v1446_v8, %v1840_v49  ;;  %v1351_v12 = vunpack.c.l.bf16 %v1385_v63 }
  0xdb   :  { %v311_v18 = vpop.f32.mrf.mxu0 }
  0xdc   :  { %v394_v9 = vpop.f32.mrf.mxu1  ;;  %1565 = vtanh.f32 %v552_v25  ;;  %v557_v50 = vadd.f32 %v1327_v31, %v461_v28  ;;  %v459_v51 = vadd.f32 %v1840_v49, %v311_v18  ;;  %v1355_v25 = vunpack.c.l.bf16 %v1900_v14  ;;  %v1387_v31 = vld [vmem:[%s2206_s1 + $0x58] sm:$0xff]  }
  0xdd   :  { %v480_v16 = vadd.f32 %v1833_v44, %v394_v9  ;;  %v1447_v34 = vpop.f32.mrf.mxu0  ;;  %v1324_v9 = vunpack.c.h.bf16 %v1378_v32  ;;  %v1352_v28 = vunpack.c.h.bf16 %v1385_v63  ;;  %v475_v32 = vadd.f32 %v1833_v44, %v1831_v42 }
  0xde   :  { %v1470_v19 = vpop.f32.mrf.mxu1  ;;  %v555_v2 = vadd.f32 %v1323_v40, %v459_v51  ;;  %v462_v3 = vadd.f32 %v1447_v34, %v1840_v49  ;;  %v478_v63 = vadd.f32 %v1835_v47, %v1833_v44 }
  0xdf   :  { %v485_v21 = vadd.f32 %v1470_v19, %v1833_v44  ;;  %v576_v33 = vadd.f32 %v1364_v17, %v480_v16  ;;  %v314_v56 = vpop.f32.mrf.mxu0  ;;  %v473_v17 = vadd.f32 %v1815_v27, %v1833_v44  ;;  %v1909_v19 = vld [vmem:[%s2206_s1 + $0x28] sm:$0xff]   ;;  %v474_v27 = vadd.f32 %v1820_v30, %v1833_v44 }
  0xe0   :  { %v407_v23 = vpop.f32.mrf.mxu1  ;;  %v460_v16 = vadd.f32 %v1840_v49, %v314_v56  ;;  %v558_v18 = vadd.f32 %v1328_v4, %v462_v3  ;;  %v1335_v34 = vunpack.c.l.bf16 %v1909_v19  ;;  %v571_v51 = vadd.f32 %v1355_v25, %v475_v32 }
  0xe1   :  { %v483_v35 = vadd.f32 %v1833_v44, %v407_v23  ;;  %v581_v41 = vadd.f32 %v1375_v22, %v485_v21  ;;  %1567 = vtanh.f32 %v576_v33  ;;  %v1450_v7 = vpop.f32.mrf.mxu0  ;;  %v1336_v3 = vunpack.c.h.bf16 %v1909_v19 }
  0xe2   :  { %v1471_v38 = vpop.f32.mrf.mxu1  ;;  %v556_v33 = vadd.f32 %v1324_v9, %v460_v16  ;;  %v465_v30 = vadd.f32 %v1450_v7, %v1840_v49 }
  0xe3   :  { %v486_v43 = vadd.f32 %v1471_v38, %v1833_v44  ;;  %v1556_v48 = vpop.eup %1555  ;;  %v579_v55 = vadd.f32 %v1371_v37, %v483_v35  ;;  %1569 = vtanh.f32 %v581_v41  ;;  %v327_v23 = vpop.f32.mrf.mxu0  ;;  %v1925_v35 = vld [vmem:[%s2206_s1 + $0x20] sm:$0xff]   ;;  %v569_v37 = vadd.f32 %v1351_v12, %v473_v17 }
  0xe4   :  { %v410_v46 = vpop.f32.mrf.mxu1  ;;  %v1558_v54 = vpop.eup %1557  ;;  %v638_v58 = vmul.f32 %v1556_v48, %v1884_v39  ;;  %1571 = vtanh.f32 %v557_v50  ;;  %v1331_v48 = vunpack.c.l.bf16 %v1925_v35  ;;  %v570_v50 = vadd.f32 %v1352_v28, %v474_v27 }
  0xe5   :  { %v484_v57 = vadd.f32 %v1833_v44, %v410_v46  ;;  %v582_v59 = vadd.f32 %v1376_v45, %v486_v43  ;;  %v639_v62 = vmul.f32 %v1558_v54, %v1884_v39  ;;  %v1560_v5 = vpop.eup %1559  ;;  %1573 = vtanh.f32 %v579_v55  ;;  %v1451_v43 = vpop.f32.mrf.mxu0 }
  0xe6   :  { %v702_v61 = vsel %vm51_vm3, %v638_v58, 0.0  ;;  %v624_v10 = vmul.f32 %v1560_v5, %v1884_v39  ;;  %v1562_v13 = vpop.eup %1561  ;;  %v477_v45 = vadd.f32 %v1823_v36, %v1833_v44  ;;  %v1359_v46 = vunpack.c.l.bf16 %v1387_v31 }
  0xe7   :  { %703 = vadd.xlane.f32.xlu1 %v702_v61  ;;  %v580_v8 = vadd.f32 %v1372_v52, %v484_v57  ;;  %1575 = vtanh.f32 %v582_v59  ;;  %v705_v15 = vsel %vm51_vm3, %v639_v62, 0.0  ;;  %v622_v21 = vmul.f32 %v1562_v13, %v1884_v39  ;;  %v1564_v22 = vpop.eup %1563  ;;  %v330_v36 = vpop.f32.mrf.mxu0 }
  0xe8   :  { %1577 = vtanh.f32 %v555_v2  ;;  %v660_v20 = vsel %vm51_vm3, %v624_v10, 0.0  ;;  %v625_v40 = vmul.f32 %v1564_v22, %v1884_v39  ;;  %v463_v52 = vadd.f32 %v1840_v49, %v327_v23 }
  0xe9   :  { %1579 = vtanh.f32 %v580_v8  ;;  %661 = vadd.xlane.f32.xlu0 %v660_v20  ;;  %v654_v38 = vsel %vm51_vm3, %v622_v21, 0.0  ;;  %v1566_v41 = vpop.eup %1565  ;;  %v561_v56 = vadd.f32 %v1335_v34, %v465_v30  ;;  %v1360_v2 = vunpack.c.h.bf16 %v1387_v31  ;;  %v1454_v47 = vpop.f32.mrf.mxu0  ;;  %v1389_v21 = vld [vmem:[%s2206_s1 + $0x68] sm:$0xff]  }
  0xea   :  { %1581 = vtanh.f32 %v558_v18  ;;  %v663_v57 = vsel %vm51_vm3, %v625_v40, 0.0  ;;  %v623_v58 = vmul.f32 %v1566_v41, %v1884_v39  ;;  %v573_v4 = vadd.f32 %v1359_v46, %v477_v45 }
  0xeb   :  { %706 = vadd.xlane.f32.xlu1 %v705_v15  ;;  %1583 = vtanh.f32 %v556_v33  ;;  %v559_v5 = vadd.f32 %v1331_v48, %v463_v52  ;;  %v466_v9 = vadd.f32 %v1451_v43, %v1840_v49  ;;  %v476_v17 = vadd.f32 %v1833_v44, %v1844_v53  ;;  %v1968_v53 = vld [vmem:[%s2206_s1 + $0x38] sm:$0xff]   ;;  %v343_v31 = vpop.f32.mrf.mxu0 }
  0xec   :  { %1585 = vtanh.f32 %v569_v37  ;;  %v657_v10 = vsel %vm51_vm3, %v623_v58, 0.0  ;;  %v1356_v18 = vunpack.c.h.bf16 %v1900_v14  ;;  %v1332_v19 = vunpack.c.h.bf16 %v1925_v35 }
  0xed   :  { %655 = vadd.xlane.f32.xlu0 %v654_v38  ;;  %1587 = vtanh.f32 %v570_v50  ;;  %v574_v20 = vadd.f32 %v1360_v2, %v478_v63  ;;  %v464_v22 = vadd.f32 %v1840_v49, %v330_v36  ;;  %v562_v25 = vadd.f32 %v1336_v3, %v466_v9  ;;  %v1382_v38 = vld [vmem:[%s2206_s1 + $0x30] sm:$0xff]   ;;  %v1455_v45 = vpop.f32.mrf.mxu0 }
  0xee   :  { %v1568_v42 = vpop.eup %1567  ;;  %1589 = vtanh.f32 %v571_v51  ;;  %v572_v32 = vadd.f32 %v1356_v18, %v476_v17  ;;  %v481_v33 = vadd.f32 %v1850_v60, %v1833_v44  ;;  %v1367_v34 = vunpack.c.l.bf16 %v1389_v21 }
  0xef   :  { %v1935_v54 = vmul.f32 %v1568_v42, %v1884_v39  ;;  %1591 = vtanh.f32 %v561_v56  ;;  %v560_v35 = vadd.f32 %v1332_v19, %v464_v22  ;;  %v469_v37 = vadd.f32 %v1454_v47, %v1840_v49  ;;  %v346_v63 = vpop.f32.mrf.mxu0 }
  0xf0   :  { %v1570_v55 = vpop.eup %1569  ;;  %1593 = vtanh.f32 %v573_v4  ;;  %v1343_v30 = vunpack.c.l.bf16 %v1968_v53  ;;  %v1363_v60 = vunpack.c.l.bf16 %v1861_v11  ;;  %v577_v46 = vadd.f32 %v1367_v34, %v481_v33 }
  0xf1   :  { %v1572_v59 = vpop.eup %1571  ;;  %664 = vadd.xlane.f32.xlu0 %v663_v57  ;;  %v1940_v61 = vmul.f32 %v1570_v55, %v1884_v39  ;;  %1595 = vtanh.f32 %v559_v5  ;;  %v1339_v48 = vunpack.c.l.bf16 %v1382_v38  ;;  %v479_v52 = vadd.f32 %v1833_v44, %v1853_v0 }
  0xf2   :  { %v1574_v62 = vpop.eup %1573  ;;  %v628_v12 = vmul.f32 %v1572_v59, %v1884_v39  ;;  %1597 = vtanh.f32 %v574_v20  ;;  %v565_v55 = vadd.f32 %v1343_v30, %v469_v37  ;;  %v467_v56 = vadd.f32 %v1840_v49, %v343_v31 }
  0xf3   :  { %v1946_v7 = vmul.f32 %v1574_v62, %v1884_v39  ;;  %1599 = vtanh.f32 %v562_v25  ;;  %v482_v0 = vadd.f32 %v1856_v6, %v1833_v44  ;;  %v1368_v2 = vunpack.c.h.bf16 %v1389_v21 }
  0xf4   :  { %v1576_v8 = vpop.eup %1575  ;;  %v672_v14 = vsel %vm51_vm3, %v628_v12, 0.0  ;;  %1601 = vtanh.f32 %v572_v32  ;;  %v1340_v3 = vunpack.c.h.bf16 %v1382_v38  ;;  %v575_v4 = vadd.f32 %v1363_v60, %v479_v52 }
  0xf5   :  { %v1578_v13 = vpop.eup %1577  ;;  %658 = vadd.xlane.f32.xlu0 %v657_v10  ;;  %v1952_v16 = vmul.f32 %v1576_v8, %v1884_v39  ;;  %1603 = vtanh.f32 %v560_v35  ;;  %v563_v5 = vadd.f32 %v1339_v48, %v467_v56  ;;  %v468_v10 = vadd.f32 %v1840_v49, %v346_v63 }
  0xf6   :  { %v1580_v15 = vpop.eup %1579  ;;  %v626_v27 = vmul.f32 %v1578_v13, %v1884_v39  ;;  %1605 = vtanh.f32 %v577_v46  ;;  %v578_v44 = vadd.f32 %v1368_v2, %v482_v0  ;;  %v1344_v6 = vunpack.c.h.bf16 %v1968_v53 }
  0xf7   :  { %v1963_v23 = vmul.f32 %v1580_v15, %v1884_v39  ;;  %v1582_v28 = vpop.eup %1581  ;;  %1607 = vtanh.f32 %v565_v55  ;;  %v470_v17 = vadd.f32 %v1455_v45, %v1840_v49  ;;  %v564_v21 = vadd.f32 %v1340_v3, %v468_v10 }
  0xf8   :  { %v1584_v40 = vpop.eup %1583  ;;  %v666_v41 = vsel %vm51_vm3, %v626_v27, 0.0  ;;  %v629_v43 = vmul.f32 %v1582_v28, %v1884_v39  ;;  %1609 = vtanh.f32 %v575_v4  ;;  %v729_v2 = vsel %vm51_vm3, %v1935_v54, 0.0 }
  0xf9   :  { %673 = vadd.xlane.f32.xlu0 %v672_v14  ;;  %v1586_v42 = vpop.eup %1585  ;;  %v627_v36 = vmul.f32 %v1584_v40, %v1884_v39  ;;  %1611 = vtanh.f32 %v563_v5  ;;  %v566_v31 = vadd.f32 %v1344_v6, %v470_v17  ;;  %v744_v4 = vsel %vm51_vm3, %v1940_v61, 0.0 }
  0xfa   :  { %v640_v50 = vmul.f32 %v1586_v42, %v1884_v39  ;;  %v1588_v51 = vpop.eup %1587  ;;  %v675_v59 = vsel %vm51_vm3, %v629_v43, 0.0  ;;  %1613 = vtanh.f32 %v578_v44  ;;  %v738_v5 = vsel %vm51_vm3, %v1946_v7, 0.0 }
  0xfb   :  { %v1590_v57 = vpop.eup %1589  ;;  %v641_v11 = vmul.f32 %v1588_v51, %v1884_v39  ;;  %v669_v13 = vsel %vm51_vm3, %v627_v36, 0.0  ;;  %1615 = vtanh.f32 %v564_v21 }
  0xfc   :  { %v708_v58 = vsel %vm51_vm3, %v640_v50, 0.0  ;;  %v1592_v62 = vpop.eup %1591  ;;  %v642_v8 = vmul.f32 %v1590_v57, %v1884_v39  ;;  %1617 = vtanh.f32 %v566_v31 }
  0xfd   :  { %667 = vadd.xlane.f32.xlu0 %v666_v41  ;;  %709 = vadd.xlane.f32.xlu1 %v708_v58  ;;  %v1594_v9 = vpop.eup %1593  ;;  %v711_v12 = vsel %vm51_vm3, %v641_v11, 0.0  ;;  %v632_v47 = vmul.f32 %v1592_v62, %v1884_v39 }
  0xfe   :  { %v1596_v15 = vpop.eup %1595  ;;  %v714_v18 = vsel %vm51_vm3, %v642_v8, 0.0  ;;  %v644_v19 = vmul.f32 %v1594_v9, %v1884_v39  ;;  %v747_v8 = vsel %vm51_vm3, %v1952_v16, 0.0 }
  0xff   :  { %v1598_v20 = vpop.eup %1597  ;;  %v684_v22 = vsel %vm51_vm3, %v632_v47, 0.0  ;;  %v630_v25 = vmul.f32 %v1596_v15, %v1884_v39 }
 0x100   :  { %v1600_v14 = vpop.eup %1599  ;;  %v720_v53 = vsel %vm51_vm3, %v644_v19, 0.0  ;;  %v645_v49 = vmul.f32 %v1598_v20, %v1884_v39  ;;  %v2048_v20 = vand.u32 127, %v426_v24 }
 0x101   :  { %676 = vadd.xlane.f32.xlu0 %v675_v59  ;;  %712 = vadd.xlane.f32.xlu1 %v711_v12  ;;  %v1602_v27 = vpop.eup %1601  ;;  %v678_v32 = vsel %vm51_vm3, %v630_v25, 0.0  ;;  %v633_v33 = vmul.f32 %v1600_v14, %v1884_v39 }
 0x102   :  { %v1604_v28 = vpop.eup %1603  ;;  %v723_v35 = vsel %vm51_vm3, %v645_v49, 0.0  ;;  %v643_v30 = vmul.f32 %v1602_v27, %v1884_v39  ;;  %v790_v21 = vadd.s32 4294967288, %v2048_v20  ;;  %v797_v14 = vadd.s32 4294967280, %v2048_v20 }
 0x103   :  { %v1606_v34 = vpop.eup %1605  ;;  %v687_v38 = vsel %vm51_vm3, %v633_v33, 0.0  ;;  %v631_v40 = vmul.f32 %v1604_v28, %v1884_v39  ;;  %v788_v49 = vsub.s32 %v2048_v20, %v1813_v26  ;;  %v804_v28 = vadd.s32 4294967272, %v2048_v20 }
 0x104   :  { %v1608_v37 = vpop.eup %1607  ;;  %v717_v43 = vsel %vm51_vm3, %v643_v30, 0.0  ;;  %v648_v42 = vmul.f32 %v1606_v34, %v1884_v39  ;;  %v793_v27 = vsub.s32 %v790_v21, %v1813_v26  ;;  %v818_v24 = vadd.s32 4294967256, %v2048_v20 }
 0x105   :  { %670 = vadd.xlane.f32.xlu0 %v669_v13  ;;  %715 = vadd.xlane.f32.xlu1 %v714_v18  ;;  %v1610_v41 = vpop.eup %1609  ;;  %v681_v60 = vsel %vm51_vm3, %v631_v40, 0.0  ;;  %v636_v45 = vmul.f32 %v1608_v37, %v1884_v39  ;;  %v811_v33 = vadd.s32 4294967264, %v2048_v20  ;;  %v807_v30 = vsub.s32 %v804_v28, %v1813_v26 }
 0x106   :  { %v1612_v46 = vpop.eup %1611  ;;  %v732_v50 = vsel %vm51_vm3, %v648_v42, 0.0  ;;  %v646_v51 = vmul.f32 %v1610_v41, %v1884_v39  ;;  %v821_v40 = vsub.s32 %v818_v24, %v1813_v26  ;;  %v825_v42 = vadd.s32 4294967248, %v2048_v20 }
 0x107   :  { %v1614_v48 = vpop.eup %1613  ;;  %v696_v52 = vsel %vm51_vm3, %v636_v45, 0.0  ;;  %v634_v55 = vmul.f32 %v1612_v46, %v1884_v39  ;;  %v832_v45 = vadd.s32 4294967240, %v2048_v20  ;;  %v839_v46 = vadd.s32 4294967232, %v2048_v20 }
 0x108   :  { %v1616_v56 = vpop.eup %1615  ;;  %v726_v57 = vsel %vm51_vm3, %v646_v51, 0.0  ;;  %v649_v58 = vmul.f32 %v1614_v48, %v1884_v39 }
 0x109   :  { %685 = vadd.xlane.f32.xlu0 %v684_v22  ;;  %721 = vadd.xlane.f32.xlu1 %v720_v53  ;;  %v690_v11 = vsel %vm51_vm3, %v634_v55, 0.0  ;;  %v635_v59 = vmul.f32 %v1616_v56, %v1884_v39  ;;  %v1618_v36 = vpop.eup %1617  ;;  %v846_v55 = vadd.s32 4294967224, %v2048_v20 }
 0x10a   :  { %v735_v62 = vsel %vm51_vm3, %v649_v58, 0.0  ;;  %v637_v0 = vmul.f32 %v1618_v36, %v1884_v39  ;;  %v741_v39 = vsel %vm51_vm3, %v1963_v23, 0.0 }
 0x10b   :  { %v693_v63 = vsel %vm51_vm3, %v635_v59, 0.0 }
 0x10c   :  { %v699_v3 = vsel %vm51_vm3, %v637_v0, 0.0  ;;  %vm974_vm3 = vcmask 1041409  }
 0x10d   :  { %679 = vadd.xlane.f32.xlu0 %v678_v32  ;;  %724 = vadd.xlane.f32.xlu1 %v723_v35  ;;  %v800_v32 = vsub.s32 %v797_v14, %v1813_v26 }
 0x111   :  { %688 = vadd.xlane.f32.xlu0 %v687_v38  ;;  %718 = vadd.xlane.f32.xlu1 %v717_v43  ;;  %v814_v43 = vsub.s32 %v811_v33, %v1813_v26 }
 0x115   :  { %682 = vadd.xlane.f32.xlu0 %v681_v60  ;;  %733 = vadd.xlane.f32.xlu1 %v732_v50 }
 0x119   :  { %697 = vadd.xlane.f32.xlu0 %v696_v52  ;;  %727 = vadd.xlane.f32.xlu1 %v726_v57 }
 0x11d   :  { %691 = vadd.xlane.f32.xlu0 %v690_v11  ;;  %736 = vadd.xlane.f32.xlu1 %v735_v62  ;;  %v828_v62 = vsub.s32 %v825_v42, %v1813_v26 }
 0x121   :  { %694 = vadd.xlane.f32.xlu0 %v693_v63  ;;  %730 = vadd.xlane.f32.xlu1 %v729_v2 }
 0x125   :  { %700 = vadd.xlane.f32.xlu0 %v699_v3  ;;  %745 = vadd.xlane.f32.xlu1 %v744_v4 }
 0x129   :  { %739 = vadd.xlane.f32.xlu1 %v738_v5  ;;  %v835_v5 = vsub.s32 %v832_v45, %v1813_v26 }
 0x12d   :  { %742 = vadd.xlane.f32.xlu1 %v741_v39  ;;  %v842_v39 = vsub.s32 %v839_v46, %v1813_v26 }
 0x131   :  { %748 = vadd.xlane.f32.xlu1 %v747_v8 }
 0x170   :  { %v704_v12 = vpop.xlane.xlu1 %703 }
 0x171   :  { %v898_v57 = vrot.slane %v704_v12, %v788_v49 }
 0x172   :  { %v662_v54 = vpop.xlane.xlu0 %661 }
 0x173   :  { %v801_v41 = vrot.slane %v662_v54, %v800_v32 }
 0x174   :  { %v707_v61 = vpop.xlane.xlu1 %706 }
 0x175   :  { %v902_v60 = vrot.slane %v707_v61, %v793_v27  ;;  %v853_v61 = vadd.s32 4294967216, %v2048_v20 }
 0x176   :  { %v656_v9 = vpop.xlane.xlu0 %655 }
 0x177   :  { %v789_v35 = vrot.slane %v656_v9, %v788_v49  ;;  %v903_v63 = vsel %vm795_vm4, %v902_v60, %v898_v57  ;;  %v874_v49 = vadd.s32 4294967192, %v2048_v20  ;;  %v881_v60 = vadd.s32 4294967184, %v2048_v20 }
 0x17a   :  { %v665_v10 = vpop.xlane.xlu0 %664 }
 0x17b   :  { %v808_v58 = vrot.slane %v665_v10, %v807_v30  ;;  %v849_v10 = vsub.s32 %v846_v55, %v1813_v26 }
 0x17e   :  { %v659_v13 = vpop.xlane.xlu0 %658 }
 0x17f   :  { %v794_v31 = vrot.slane %v659_v13, %v793_v27  ;;  %v867_v27 = vadd.s32 4294967200, %v2048_v20 }
 0x181   :  { %v796_v38 = vsel %vm795_vm4, %v794_v31, %v789_v35  ;;  %v856_v31 = vsub.s32 %v853_v61, %v1813_v26 }
 0x182   :  { %v2037_v47 = vpop.xlane.xlu0 %673  ;;  %v803_v50 = vsel %vm802_vm5, %v801_v41, %v796_v38  ;;  %v877_v41 = vsub.s32 %v874_v49, %v1813_v26 }
 0x183   :  { %v810_v0 = vsel %vm809_vm6, %v808_v58, %v803_v50  ;;  %v829_v13 = vrot.slane %v2037_v47, %v828_v62  ;;  %v884_v58 = vsub.s32 %v881_v60, %v1813_v26 }
 0x186   :  { %v668_v15 = vpop.xlane.xlu0 %667  ;;  %v710_v44 = vpop.xlane.xlu1 %709 }
 0x187   :  { %v907_v48 = vrot.slane %v710_v44, %v800_v32  ;;  %v815_v51 = vrot.slane %v668_v15, %v814_v43 }
 0x189   :  { %v908_v3 = vsel %vm802_vm5, %v907_v48, %v903_v63  ;;  %v817_v4 = vsel %vm816_vm8, %v815_v51, %v810_v0  ;;  %vm978_vm5 = vcmask 1041408  }
 0x18a   :  { %v2039_v7 = vpop.xlane.xlu0 %676  ;;  %v713_v6 = vpop.xlane.xlu1 %712 }
 0x18b   :  { %v912_v11 = vrot.slane %v713_v6, %v807_v30  ;;  %v860_v6 = vadd.s32 4294967208, %v2048_v20 }
 0x18d   :  { %v913_v54 = vsel %vm809_vm6, %v912_v11, %v908_v3 }
 0x18e   :  { %v671_v17 = vpop.xlane.xlu0 %670  ;;  %v716_v23 = vpop.xlane.xlu1 %715 }
 0x18f   :  { %v822_v59 = vrot.slane %v671_v17, %v821_v40  ;;  %v917_v36 = vrot.slane %v716_v23, %v814_v43 }
 0x191   :  { %v824_v9 = vsel %vm823_vm7, %v822_v59, %v817_v4  ;;  %v918_v12 = vsel %vm816_vm8, %v917_v36, %v913_v54 }
 0x192   :  { %v2041_v18 = vpop.xlane.xlu0 %685  ;;  %v2043_v19 = vpop.xlane.xlu1 %721  ;;  %v831_v23 = vsel %vm830_vm9, %v829_v13, %v824_v9 }
 0x193   :  { %v927_v17 = vrot.slane %v2043_v19, %v828_v62  ;;  %v857_v43 = vrot.slane %v2041_v18, %v856_v31 }
 0x196   :  { %v2045_v16 = vpop.xlane.xlu0 %679  ;;  %v2051_v22 = vpop.xlane.xlu1 %724 }
 0x197   :  { %v843_v21 = vrot.slane %v2045_v16, %v842_v39  ;;  %v932_v19 = vrot.slane %v2051_v22, %v835_v5  ;;  %v888_v22 = vadd.s32 4294967176, %v2048_v20 }
 0x199   :  { %v891_v57 = vsub.s32 %v888_v22, %v1813_v26 }
 0x19a   :  { %v2053_v25 = vpop.xlane.xlu0 %688  ;;  %v719_v53 = vpop.xlane.xlu1 %718 }
 0x19b   :  { %v922_v2 = vrot.slane %v719_v53, %v821_v40  ;;  %v836_v53 = vrot.slane %v2039_v7, %v835_v5  ;;  %v863_v7 = vsub.s32 %v860_v6, %v1813_v26  ;;  %v750_v5 = vld [vmem:[%s2209_s4] sm:$0x3]  ;;  %v1540_v6 = vld [vmem:[%s2208_s3 + $0x78] sm:$0xff]  }
 0x19c   :  { %vm751_vm4 = vcmp.ne.s32.totalorder %v750_v5, 0  ;;  %1493 = vmatpush3.bf16.msra.mxu1 %v1540_v6 }
 0x19d   :  { %v923_v44 = vsel %vm823_vm7, %v922_v2, %v918_v12  ;;  %v838_v16 = vsel %vm837_vm10, %v836_v53, %v831_v23  ;;  %v1542_v23 = vld [vmem:[%s2208_s3 + $0x70] sm:$0xff]   ;;  %1494 = vmatprep.subr.bf16.mxu1 %v1667_v1 }
 0x19e   :  { %v2063_v34 = vpop.xlane.xlu0 %682  ;;  %v2065_v37 = vpop.xlane.xlu1 %733  ;;  %v928_v28 = vsel %vm830_vm9, %v927_v17, %v923_v44  ;;  %v845_v33 = vsel %vm844_vm11, %v843_v21, %v838_v16  ;;  %v1539_v44 = vld [vmem:[%s2208_s3 + $0x38] sm:$0xff]   ;;  %v1541_v17 = vld [vmem:[%s2208_s3 + $0x30] sm:$0xff]   ;;  %v1543_v21 = vld [vmem:[%s2208_s3 + $0x28] sm:$0xff]  }
 0x19f   :  { %v850_v47 = vrot.slane %v2063_v34, %v849_v10  ;;  %v870_v34 = vsub.s32 %v867_v27, %v1813_v26  ;;  %v933_v38 = vsel %vm837_vm10, %v932_v19, %v928_v28  ;;  %v947_v46 = vrot.slane %v2065_v37, %v856_v31  ;;  %1473 = vmatpush3.bf16.msra.mxu0 %v1539_v44  ;;  %v1544_v28 = vld [vmem:[%s2208_s3 + $0x68] sm:$0xff]   ;;  %v1545_v31 = vld [vmem:[%s2208_s3 + $0x20] sm:$0xff]   ;;  %v1547_v19 = vld [vmem:[%s2208_s3 + $0x18] sm:$0xff]  }
 0x1a0   :  { %1474 = vmatprep.subr.bf16.mxu0 %v1667_v1  ;;  %1495 = vmatpush3.bf16.msra.mxu1 %v1542_v23  ;;  %v1548_v16 = vld [vmem:[%s2208_s3 + $0x58] sm:$0xff]  }
 0x1a1   :  { %v852_v40 = vsel %vm851_vm12, %v850_v47, %v845_v33  ;;  %1496 = vmatprep.subr.bf16.mxu1 %v1667_v1  ;;  %v1550_v33 = vld [vmem:[%s2208_s3 + $0x50] sm:$0xff]  }
 0x1a2   :  { %v728_v52 = vpop.xlane.xlu1 %727  ;;  %v2076_v56 = vpop.xlane.xlu0 %697  ;;  %v859_v48 = vsel %vm858_vm13, %v857_v43, %v852_v40 }
 0x1a3   :  { %v937_v24 = vrot.slane %v728_v52, %v842_v39  ;;  %v864_v52 = vrot.slane %v2053_v25, %v863_v7  ;;  %v885_v3 = vrot.slane %v2076_v56, %v884_v58  ;;  %1475 = vmatpush3.bf16.msra.mxu0 %v1541_v17 }
 0x1a4   :  { %1476 = vmatprep.subr.bf16.mxu0 %v1667_v1  ;;  %1497 = vmatpush3.bf16.msra.mxu1 %v1544_v28 }
 0x1a5   :  { %v938_v42 = vsel %vm844_vm11, %v937_v24, %v933_v38  ;;  %v866_v59 = vsel %vm865_vm14, %v864_v52, %v859_v48  ;;  %1498 = vmatprep.subr.bf16.mxu1 %v1667_v1  ;;  %v1546_v24 = vld [vmem:[%s2208_s3 + $0x60] sm:$0xff]  }
 0x1a6   :  { %v2083_v8 = vpop.xlane.xlu1 %736  ;;  %v692_v15 = vpop.xlane.xlu0 %691 }
 0x1a7   :  { %v871_v51 = vrot.slane %v692_v15, %v870_v34  ;;  %v952_v37 = vrot.slane %v2083_v8, %v863_v7  ;;  %1477 = vmatpush3.bf16.msra.mxu0 %v1543_v21  ;;  %v1551_v7 = vld [vmem:[%s2208_s3 + $0x8] sm:$0xff]  }
 0x1a8   :  { %1478 = vmatprep.subr.bf16.mxu0 %v1667_v1  ;;  %1499 = vmatpush3.bf16.msra.mxu1 %v1546_v24 }
 0x1a9   :  { %v873_v36 = vsel %vm872_vm15, %v871_v51, %v866_v59  ;;  %1500 = vmatprep.subr.bf16.mxu1 %v1667_v1 }
 0x1aa   :  { %v731_v14 = vpop.xlane.xlu1 %730  ;;  %v695_v30 = vpop.xlane.xlu0 %694 }
 0x1ab   :  { %v942_v32 = vrot.slane %v731_v14, %v849_v10  ;;  %v878_v55 = vrot.slane %v695_v30, %v877_v41  ;;  %1479 = vmatpush3.bf16.msra.mxu0 %v1545_v31  ;;  %v1554_v30 = vld [vmem:[%s2208_s3 + $0x40] sm:$0xff]  }
 0x1ac   :  { %1480 = vmatprep.subr.bf16.mxu0 %v1667_v1  ;;  %1501 = vmatpush3.bf16.msra.mxu1 %v1548_v16 }
 0x1ad   :  { %v943_v45 = vsel %vm851_vm12, %v942_v32, %v938_v42  ;;  %v880_v0 = vsel %vm879_vm0, %v878_v55, %v873_v36  ;;  %v1549_v32 = vld [vmem:[%s2208_s3 + $0x10] sm:$0xff]   ;;  %1502 = vmatprep.subr.bf16.mxu1 %v1667_v1 }
 0x1ae   :  { %v746_v35 = vpop.xlane.xlu1 %745  ;;  %v948_v18 = vsel %vm858_vm13, %v947_v46, %v943_v45  ;;  %v701_v11 = vpop.xlane.xlu0 %700  ;;  %v887_v54 = vsel %vm886_vm1, %v885_v3, %v880_v0 }
 0x1af   :  { %v953_v25 = vsel %vm865_vm14, %v952_v37, %v948_v18  ;;  %v892_v2 = vrot.slane %v701_v11, %v891_v57  ;;  %v967_v39 = vrot.slane %v746_v35, %v884_v58  ;;  %1481 = vmatpush3.bf16.msra.mxu0 %v1547_v19  ;;  %v1552_v35 = vld [vmem:[%s2208_s3 + $0x48] sm:$0xff]  }
 0x1b0   :  { %1482 = vmatprep.subr.bf16.mxu0 %v1667_v1  ;;  %1503 = vmatpush3.bf16.msra.mxu1 %v1550_v33 }
 0x1b1   :  { %v894_v10 = vsel %vm893_vm2, %v892_v2, %v887_v54  ;;  %1504 = vmatprep.subr.bf16.mxu1 %v1667_v1 }
 0x1b2   :  { %v740_v50 = vpop.xlane.xlu1 %739 }
 0x1b3   :  { %v957_v20 = vrot.slane %v740_v50, %v870_v34  ;;  %1483 = vmatpush3.bf16.msra.mxu0 %v1549_v32  ;;  %v1553_v34 = vld [vmem:[%s2208_s3] sm:$0xff]   ;;  %s1670_s3 = smov [#allocation4]  }
 0x1b4   :  { %1484 = vmatprep.subr.bf16.mxu0 %v1667_v1  ;;  %1505 = vmatpush3.bf16.msra.mxu1 %v1552_v35  ;;  %s1249_s12 = sshll.u32 %s1670_s3, 4  ;;  %s1250_s12 = int_to_ptr.vmem [resolvable:$true] %s1249_s12 }
 0x1b5   :  { %v958_v26 = vsel %vm872_vm15, %v957_v20, %v953_v25  ;;  %1506 = vmatprep.subr.bf16.mxu1 %v1667_v1  ;;  %s1623_s13 = scalar_lea.vmem %s1250_s12, 32  ;;  %p1628_p1 = scmp.lt.s32.totalorder %s1250_s12, %s1250_s12 }
 0x1b6   :  { %v743_v62 = vpop.xlane.xlu1 %742  ;;  %p1624_p0 = scmp.ne.s32.totalorder %s1250_s12, %s1623_s13  ;;  %p1629_p2 = scmp.lt.s32.totalorder %s1623_s13, %s1623_s13 }
 0x1b7   :  { %v962_v63 = vrot.slane %v743_v62, %v877_v41  ;;  %1485 = vmatpush3.bf16.msra.mxu0 %v1551_v7 }
 0x1b8   :  { %1486 = vmatprep.subr.bf16.mxu0 %v1667_v1  ;;  %1507 = vmatpush3.bf16.msra.mxu1 %v1554_v30  ;;  %p1630_p3 = por %p1629_p2, %p1628_p1 }
 0x1b9   :  { %v963_v4 = vsel %vm879_vm0, %v962_v63, %v958_v26 }
 0x1ba   :  { %v749_v8 = vpop.xlane.xlu1 %748  ;;  %v968_v12 = vsel %vm886_vm1, %v967_v39, %v963_v4  ;;  %p1631_p4 = pnand %p1630_p3, %p1624_p0 }
 0x1bb   :  { %v972_v9 = vrot.slane %v749_v8, %v891_v57  ;;  %1487 = vmatpush3.bf16.msra.mxu0 %v1553_v34 }
 0x1bd   :  { %v973_v13 = vsel %vm893_vm2, %v972_v9, %v968_v12 }
 0x1be   :  { %v975_v56 = vsel %vm974_vm3, %v973_v13, %v894_v10 }
 0x1bf   :  { %v977_v61 = vsel %vm751_vm4, -inf, %v975_v56 }
 0x1c0   :  { %v979_v15 = vsel %vm978_vm5, %v977_v61, -inf }
 0x1c1   :  { %980 = vmax.xlane.f32.xlu0 %v979_v15 }
 0x24a   :  { %v981_v14 = vpop.xlane.xlu0 %980 }
 0x24b   :  { %v982_v27 = vsub.f32 %v977_v61, %v981_v14 }
 0x24d   :  { %v983_v53 = vmul.f32 1.442695, %v982_v27 }
 0x24f   :  { %1619 = vpow2.f32 %v983_v53 }
 0x25c   :  { %v1620_v47 = vpop.eup %1619 }
 0x25d   :  { %v985_v49 = vsel %vm978_vm5, %v1620_v47, 0.0 }
 0x25e   :  { %986 = vadd.xlane.f32.xlu1 %v985_v49 }
 0x2e7   :  { %v987_v38 = vpop.xlane.xlu1 %986 }
 0x2e8   :  { %1621 = vrcp.f32 %v987_v38 }
 0x2f5   :  { %v1622_v40 = vpop.eup %1621 }
 0x2f6   :  { %v989_v41 = vmul.f32 %v1622_v40, %v1620_v47 }
 0x2f8   :  { %990 = vst [vmem:[#allocation4] sm:$0x3] %v989_v41  ;;  %v998_v22 = vrot.slane %v989_v41, %v1818_v29 }
 0x2fa   :  { %v1006_v43 = vrot.slane %v998_v22, %v1818_v29  ;;  %v999_v42 = vcombine.high %v998_v22, %v998_v22 }
 0x2fc   :  { %v1016_v60 = vpack.c.bf16 %v1006_v43, %v1006_v43  ;;  %v1013_v45 = vrot.slane %v999_v42, %v1818_v29 }
 0x2fe   :  { %1489 = vmatmul.mubr.bf16.vlgmr.msra.gmra.mxu0 %v1016_v60  ;;  %v1017_v46 = vpack.c.bf16 %v1013_v45, %v1013_v45 }
 0x300   :  { %1509 = vmatmul.mubr.bf16.vlgmr.msra.gmra.mxu1 %v1017_v46 }
 0x301   :  { %1634 = shalt.err (!%p1631_p4)
}
 0x302   :  { %1252 = dma.vmem_to_hbm [thread:$0]  %s1250_s12, 32, %s2214_s9, [#allocation5]   ;;  %vm1231_vm6 = vcmask 123904  }
 0x303   :  { %s1671_s15 = smov [#allocation2]  }
 0x304   :  { %s1239_s16 = sshll.u32 %s1671_s15, 4  ;;  %s1240_s16 = int_to_ptr.vmem [resolvable:$true] %s1239_s16 }
 0x305   :  { %s1643_s7 = scalar_lea.vmem %s1240_s16, 32  ;;  %p1648_p6 = scmp.lt.s32.totalorder %s1240_s16, %s1240_s16 }
 0x306   :  { %p1644_p5 = scmp.ne.s32.totalorder %s1240_s16, %s1643_s7  ;;  %p1649_p7 = scmp.lt.s32.totalorder %s1643_s7, %s1643_s7 }
 0x308   :  { %p1650_p8 = por %p1649_p7, %p1648_p6 }
 0x30a   :  { %p1651_p9 = pnand %p1650_p8, %p1644_p5 }
 0x3be   :  { %v1132_v1 = vpop.f32.mrf.mxu0 }
 0x3c0   :  { %v1490_v29 = vpop.f32.mrf.mxu0  ;;  %v1220_v48 = vpop.f32.mrf.mxu1 }
 0x3c1   :  { %v1228_v50 = vrot.slane %v1220_v48, 7 }
 0x3c2   :  { %v1135_v51 = vpop.f32.mrf.mxu0  ;;  %v1510_v52 = vpop.f32.mrf.mxu1 }
 0x3c3   :  { %v1229_v55 = vsel %vm974_vm3, %v1228_v50, %v1132_v1 }
 0x3c4   :  { %v1491_v57 = vpop.f32.mrf.mxu0  ;;  %v1223_v18 = vpop.f32.mrf.mxu1  ;;  %1232 = vst.msk [vmem:[#allocation2] sm:$0x3] %vm1231_vm6, %v1229_v55 }
 0x3c5   :  { %1654 = shalt.err (!%p1651_p9)
}
 0x3c6   :  { %1242 = dma.vmem_to_hbm [thread:$0]  %s1240_s16, 32, %s2213_s8, [#allocation3]   ;;  %v1511_v58 = vpop.f32.mrf.mxu1 }
 0x3c7   :  { %1663 = dma.done.wait [#allocation3], 32  }
 0x3c8   :  { %1664 = vsyncadd [#allocation3], 4294967264 }
 0x3c9   :  { %1665 = dma.done.wait [#allocation5], 32  }
 0x3ca   :  { %1666 = vsyncadd [#allocation5], 4294967264 }
 0x3cb   :  { %1259 = vsyncpa [#allocation3], 1 }
 0x3cc   :  { %1260 = vsyncpa [#allocation5], 1 }

</bundles_post_ra>
